<compile_context>
chip_gen: v6e
topology: v6e:2x2x1
jax: 0.10.0
libtpu: 0.0.40
codegen_flags: <defaults>
</compile_context>

<pallas_src>
import functools
import math

import jax
import jax.numpy as jnp
from jax.experimental import pallas as pl
from jax.experimental.pallas import tpu as pltpu


def _down2x2_kernel(x_ref, xh_ref, w_ref, o_ref):
    """Fused conv3x3 + PixelUnshuffle(2) as K-split MXU matmuls on one row tile.

    x_ref : (1, tr, Wc, 4*Cin)   space-to-depth rows [t*tr, (t+1)*tr)
    xh_ref: (1, 1,  Wc, 4*Cin)   bottom halo row (t+1)*tr
    w_ref : (16*Cin, 4*Cout)     folded weights; K-slice k = 2*n + m is the (n, m) tap
    o_ref : (1, tr, Wo, 4*Cout)  Wo = Wc - 1, channels already in PixelUnshuffle order
    """
    tr = x_ref.shape[1]
    wc = x_ref.shape[2]
    c4i = x_ref.shape[3]
    wo = wc - 1
    c4o = o_ref.shape[3]

    x0 = x_ref[0]                                   # (tr, Wc, 4*Cin)
    xh = xh_ref[0]                                  # (1,  Wc, 4*Cin)
    # m = 0 / m = 1 column views of the 2x2 window.
    # TODO(synk): pltpu.roll(axis=1) + prefix slice would move the m=1 shift onto
    # the idle XLU instead of a relayout copy; kept as a plain slice for safety.
    x00, x01 = x0[:, :wo, :], x0[:, 1:, :]
    xh0, xh1 = xh[:, :wo, :], xh[:, 1:, :]

    def tap(lhs, k):
        # (rows, Wo, 4*Cin) @ (4*Cin, 4*Cout) K-slice -> (rows, Wo, 4*Cout), f32 acc.
        rows = lhs.shape[0]
        wk = w_ref[k * c4i:(k + 1) * c4i, :]
        out = jnp.dot(lhs.reshape(rows * wo, c4i), wk,
                      preferred_element_type=jnp.float32)
        return out.reshape(rows, wo, c4o)

    # n = 0 taps: every output row reads its own input row.
    acc = tap(x00, 0) + tap(x01, 1)                            # (tr, Wo, 4*Cout) f32

    # n = 1 taps, halo row -> last output row of the tile.
    last = acc[tr - 1:] + tap(xh0, 2) + tap(xh1, 3)            # (1, Wo, 4*Cout)
    o_ref[0, pl.ds(tr - 1, 1)] = last.astype(o_ref.dtype)

    if tr > 1:
        # n = 1 taps, main-tile rows [1, tr) -> output rows [0, tr-1).
        top = acc[:tr - 1] + tap(x00[1:], 2) + tap(x01[1:], 3)
        o_ref[0, pl.ds(0, tr - 1)] = top.astype(o_ref.dtype)


def _fold_weights(w_oihw):
    """OIHW (Cout, Cin, 3, 3) -> (16*Cin, 4*Cout) folded conv+unshuffle weights.

    Row index  = flatten(n, m, p, q, c)  with window row ky = 2n+p, col kx = 2m+q,
                 so the K-slice for 2x2 tap (n, m) is rows [(2n+m)*4*Cin, ...+4*Cin).
    Col index  = c'*4 + dy*2 + dx        (exactly nn.PixelUnshuffle(2) order).
    """
    cout, cin = w_oihw.shape[0], w_oihw.shape[1]
    w_hwio = jnp.transpose(w_oihw, (2, 3, 1, 0))               # (ty, tx, c, c')
    wbig = jnp.zeros((4, 4, cin, cout, 2, 2), w_oihw.dtype)    # (ky, kx, c, c', dy, dx)
    for dy in range(2):
        for dx in range(2):
            wbig = wbig.at[dy:dy + 3, dx:dx + 3, :, :, dy, dx].set(w_hwio)
    wbig = wbig.reshape(2, 2, 2, 2, cin, cout, 2, 2)           # (n, p, m, q, c, c', dy, dx)
    wbig = jnp.transpose(wbig, (0, 2, 1, 3, 4, 5, 6, 7))       # (n, m, p, q, c, c', dy, dx)
    return wbig.reshape(16 * cin, 4 * cout)


def _space_to_depth_padded(x_nchw, extra_rows=0):
    """NCHW -> zero-pad(1 [+2*extra_rows bottom]) -> space-to-depth(2) -> channels-last.

    One fused XLA copy; emits H/2 + 1 + extra_rows rows so the kernel's one-row
    bottom-halo BlockSpec (and any padded remainder row tile) stays in bounds.
    """
    b, c, h, w = x_nchw.shape
    xp = jnp.pad(x_nchw, ((0, 0), (0, 0), (1, 1 + 2 * extra_rows), (1, 1)))
    hp = h + 2 + 2 * extra_rows
    xp = xp.reshape(b, c, hp // 2, 2, (w + 2) // 2, 2)         # b, c, v, p, u, q
    xp = jnp.transpose(xp, (0, 2, 4, 3, 5, 1))                 # b, v, u, p, q, c
    return xp.reshape(b, hp // 2, (w + 2) // 2, 4 * c)


def _round_up(a, b):
    return -(-a // b) * b


def _vmem_limit_bytes():
    """Scoped-VMEM limit derived from the actual chip (64 MiB v7x, 128 MiB v5e/v6e)."""
    cap = 64 * 1024 * 1024                 # conservative fallback (v7x per-TC VMEM)
    try:
        info = pltpu.get_tpu_info()
        cap = int(getattr(info, "vmem_capacity_bytes", cap) or cap)
    except Exception:                      # query unavailable: keep the fallback
        pass
    return min(cap * 4 // 5, 112 * 1024 * 1024)


def _pick_row_tile(ho, wo, c4i, c4o, itemsize, batch, vmem_limit_bytes):
    """Largest row tile whose pipelined working set fits the VMEM budget.

    Accounts for double-buffered input/output blocks, the resident folded-weight
    block (2 pipeline buffers), the in-kernel shifted-view copies and the f32
    accumulator.  Keeps tr*Wo a multiple of 8 sublanes and guarantees >=2 total
    grid steps for batch == 1 (megacore / v7x's 2 TensorCores).
    """
    wc = wo + 1
    row_in = _round_up(wc, 8) * _round_up(c4i, 128) * itemsize
    row_out = _round_up(wo, 8) * _round_up(c4o, 128) * itemsize
    row_f32 = _round_up(wo, 8) * _round_up(c4o, 128) * 4
    per_row = (2 * row_in            # main input block, double-buffered
               + 3 * row_in          # m=0/m=1 shifted views + 2-D matmul LHS copies
               + 2 * row_out         # output block, double-buffered
               + 4 * row_f32)        # f32 accumulator / partial sums / headroom
    fixed = (2 * _round_up(4 * c4i, 8) * _round_up(c4o, 128) * itemsize  # weights x2 bufs
             + 2 * row_in                                                # halo-row blocks
             + (2 << 20))                                                # misc scratch
    budget = max(vmem_limit_bytes - fixed, per_row)
    tr = max(1, min(ho, budget // per_row))
    if batch == 1 and ho >= 2:
        tr = min(tr, -(-ho // 2))    # >=2 grid steps so a second TensorCore has work
    step = 8 // math.gcd(wo, 8)      # keep tr*Wo sublane-aligned for the in-kernel reshape
    if tr >= step:
        tr -= tr % step
    return max(int(tr), 1)


@functools.partial(jax.jit, static_argnames=("downscale_factor", "nchw_output"))
def downsample_forward(x_nchw, w_oihw, downscale_factor=2, nchw_output=True):
    """Restormer Downsample: Conv2d(dim, dim//2, 3, 1, 1, bias=False) + PixelUnshuffle(2).

    nchw_output=True matches PyTorch exactly; nchw_output=False returns the kernel's
    lane-dense (B, H/2, W/2, 2*dim) layout and skips one full HBM transpose pass.
    """
    # TODO(synk): only downscale_factor == 2 (the value Restormer uses) is implemented.
    assert downscale_factor == 2
    B, Cin, H, W = x_nchw.shape
    Cout = w_oihw.shape[0]
    assert w_oihw.shape == (Cout, Cin, 3, 3)
    assert H % 2 == 0 and W % 2 == 0, "PixelUnshuffle(2) needs even H, W"

    Ho, Wo = H // 2, W // 2
    Wc = Wo + 1
    C4i, C4o = 4 * Cin, 4 * Cout

    vmem_limit = _vmem_limit_bytes()
    tr = _pick_row_tile(Ho, Wo, C4i, C4o, x_nchw.dtype.itemsize, B, vmem_limit)
    n_t = (Ho + tr - 1) // tr
    Ho_pad = n_t * tr                                           # non-divisor tr -> zero pad rows

    xrc = _space_to_depth_padded(x_nchw, extra_rows=Ho_pad - Ho)  # (B, Ho_pad+1, Wc, 4*Cin)
    # Halo invariant: the last tile's 1-row halo BlockSpec reads row n_t*tr, which
    # must exist (Pallas does no runtime OOB check on refs).
    assert xrc.shape[1] == Ho_pad + 1, (xrc.shape, Ho_pad)
    wflat = _fold_weights(w_oihw).astype(x_nchw.dtype)            # (16*Cin, 4*Cout)

    y_nhwc = pl.pallas_call(
        _down2x2_kernel,
        out_shape=jax.ShapeDtypeStruct((B, Ho_pad, Wo, C4o), x_nchw.dtype),
        grid_spec=pltpu.PrefetchScalarGridSpec(
            num_scalar_prefetch=0,
            grid=(B, n_t),
            in_specs=[
                # main row tile
                pl.BlockSpec((1, tr, Wc, C4i), lambda b, t: (b, t, 0, 0)),
                # one-row bottom halo (second view of the same array)
                pl.BlockSpec((1, 1, Wc, C4i), lambda b, t: (b, (t + 1) * tr, 0, 0)),
                # folded weights, resident across the whole grid
                # TODO(synk): pipeline_mode=pl.Buffered(1) would drop the second weight
                # buffer (worth ~half the weight VMEM at large dim on v7x).
                pl.BlockSpec((16 * Cin, C4o), lambda b, t: (0, 0)),
            ],
            out_specs=pl.BlockSpec((1, tr, Wo, C4o), lambda b, t: (b, t, 0, 0)),
        ),
        compiler_params=pltpu.CompilerParams(
            dimension_semantics=("parallel", "parallel"),
            vmem_limit_bytes=vmem_limit,
        ),
    )(xrc, xrc, wflat)

    if Ho_pad != Ho:
        y_nhwc = y_nhwc[:, :Ho]
    if nchw_output:
        # PyTorch layout; channel order already equals nn.PixelUnshuffle(2)'s.
        return jnp.transpose(y_nhwc, (0, 3, 1, 2))
    return y_nhwc


def _pixel_unshuffle_nchw(x, r=2):
    """PyTorch nn.PixelUnshuffle semantics on NCHW input (reference only)."""
    b, c, h, w = x.shape
    x = x.reshape(b, c, h // r, r, w // r, r)
    x = jnp.transpose(x, (0, 1, 3, 5, 2, 4))
    return x.reshape(b, c * r * r, h // r, w // r)


if __name__ == "__main__":
    key = jax.random.PRNGKey(0)
    kx, kw = jax.random.split(key)

    B, dim, H, W = 2, 4, 16, 16
    x = jax.random.normal(kx, (B, dim, H, W), dtype=jnp.float32)

    # Conv2d(dim, dim//2, 3, bias=False) weight, OIHW, deterministic init
    Cout = dim // 2
    fan_in = dim * 3 * 3
    bound = 1.0 / (fan_in ** 0.5)
    w = jax.random.uniform(kw, (Cout, dim, 3, 3), dtype=jnp.float32,
                           minval=-bound, maxval=bound)

    out = jax.block_until_ready(downsample_forward(x, w, downscale_factor=2))

    # sanity: (B, dim//2 * 4, H/2, W/2) = (2, 8, 8, 8)
    assert out.shape == (B, (dim // 2) * 4, H // 2, W // 2), out.shape

    # cross-check against XLA conv + pixel unshuffle
    ref_conv = jax.lax.conv_general_dilated(
        x, w, window_strides=(1, 1), padding="SAME",
        dimension_numbers=("NCHW", "OIHW", "NCHW"))
    ref = _pixel_unshuffle_nchw(ref_conv, 2)
    assert jnp.allclose(out, ref, atol=1e-4, rtol=1e-4), (
        float(jnp.max(jnp.abs(out - ref))))

    print("KERNEL_OK")
</pallas_src>

<mosaic_0001>
module attributes {stable_mosaic.version = 11 : i64} {
  func.func @_down2x2_kernel(%arg0: i32, %arg1: i32, %arg2: memref<1x8x9x16xf32, #tpu.memory_space<vmem>>, %arg3: memref<1x1x9x16xf32, #tpu.memory_space<vmem>>, %arg4: memref<64x8xf32, #tpu.memory_space<vmem>>, %arg5: memref<1x8x8x8xf32, #tpu.memory_space<vmem>>) attributes {dimension_semantics = [#tpu.dimension_semantics<parallel>, #tpu.dimension_semantics<parallel>], iteration_bounds = array<i64: 2, 1>, scalar_prefetch = 0 : i64, scratch_operands = 0 : i64, tpu.core_type = #tpu.core_type<tc>, window_params = [{transform_indices = @transform_0, window_bounds = array<i64: 1, 8, 9, 16>}, {transform_indices = @transform_1, window_bounds = array<i64: 1, 1, 9, 16>}, {pipeline_mode = #tpu.pipeline_mode<synchronous>, transform_indices = @transform_2, window_bounds = array<i64: 64, 8>}, {transform_indices = @transform_3, window_bounds = array<i64: 1, 8, 8, 8>}]} {
    %c0 = arith.constant 0 : index
    %c0_0 = arith.constant 0 : index
    %c0_1 = arith.constant 0 : index
    %c0_2 = arith.constant 0 : index
    %0 = vector.load %arg2[%c0, %c0_0, %c0_1, %c0_2] : memref<1x8x9x16xf32, #tpu.memory_space<vmem>>, vector<1x8x9x16xf32>
    %1 = vector.shape_cast %0 : vector<1x8x9x16xf32> to vector<8x9x16xf32>
    %c0_3 = arith.constant 0 : index
    %c0_4 = arith.constant 0 : index
    %c0_5 = arith.constant 0 : index
    %c0_6 = arith.constant 0 : index
    %2 = vector.load %arg3[%c0_3, %c0_4, %c0_5, %c0_6] : memref<1x1x9x16xf32, #tpu.memory_space<vmem>>, vector<1x1x9x16xf32>
    %3 = vector.shape_cast %2 : vector<1x1x9x16xf32> to vector<1x9x16xf32>
    %4 = vector.extract_strided_slice %1 {offsets = [0, 0, 0], sizes = [8, 8, 16], strides = [1, 1, 1]} : vector<8x9x16xf32> to vector<8x8x16xf32>
    %5 = vector.extract_strided_slice %1 {offsets = [0, 1, 0], sizes = [8, 8, 16], strides = [1, 1, 1]} : vector<8x9x16xf32> to vector<8x8x16xf32>
    %6 = vector.extract_strided_slice %3 {offsets = [0, 0, 0], sizes = [1, 8, 16], strides = [1, 1, 1]} : vector<1x9x16xf32> to vector<1x8x16xf32>
    %7 = vector.extract_strided_slice %3 {offsets = [0, 1, 0], sizes = [1, 8, 16], strides = [1, 1, 1]} : vector<1x9x16xf32> to vector<1x8x16xf32>
    %c0_7 = arith.constant 0 : index
    %c0_8 = arith.constant 0 : index
    %8 = vector.load %arg4[%c0_7, %c0_8] : memref<64x8xf32, #tpu.memory_space<vmem>>, vector<16x8xf32>
    %9 = vector.shape_cast %4 : vector<8x8x16xf32> to vector<64x16xf32>
    %cst = arith.constant dense<0.000000e+00> : vector<64x8xf32>
    %10 = tpu.matmul %9, %8, %cst {dimension_numbers = #tpu.dot_dimension_numbers<[1], [0], [0], [1], [0, 0, 1, 1], [], []>} : vector<64x16xf32>, vector<16x8xf32>, vector<64x8xf32> -> vector<64x8xf32>
    %11 = vector.shape_cast %10 : vector<64x8xf32> to vector<8x8x8xf32>
    %c16 = arith.constant 16 : index
    %c0_9 = arith.constant 0 : index
    %12 = vector.load %arg4[%c16, %c0_9] : memref<64x8xf32, #tpu.memory_space<vmem>>, vector<16x8xf32>
    %13 = vector.shape_cast %5 : vector<8x8x16xf32> to vector<64x16xf32>
    %cst_10 = arith.constant dense<0.000000e+00> : vector<64x8xf32>
    %14 = tpu.matmul %13, %12, %cst_10 {dimension_numbers = #tpu.dot_dimension_numbers<[1], [0], [0], [1], [0, 0, 1, 1], [], []>} : vector<64x16xf32>, vector<16x8xf32>, vector<64x8xf32> -> vector<64x8xf32>
    %15 = vector.shape_cast %14 : vector<64x8xf32> to vector<8x8x8xf32>
    %16 = arith.addf %11, %15 : vector<8x8x8xf32>
    %17 = vector.extract_strided_slice %16 {offsets = [7, 0, 0], sizes = [1, 8, 8], strides = [1, 1, 1]} : vector<8x8x8xf32> to vector<1x8x8xf32>
    %c32 = arith.constant 32 : index
    %c0_11 = arith.constant 0 : index
    %18 = vector.load %arg4[%c32, %c0_11] : memref<64x8xf32, #tpu.memory_space<vmem>>, vector<16x8xf32>
    %19 = vector.shape_cast %6 : vector<1x8x16xf32> to vector<8x16xf32>
    %cst_12 = arith.constant dense<0.000000e+00> : vector<8x8xf32>
    %20 = tpu.matmul %19, %18, %cst_12 {dimension_numbers = #tpu.dot_dimension_numbers<[1], [0], [0], [1], [0, 0, 1, 1], [], []>} : vector<8x16xf32>, vector<16x8xf32>, vector<8x8xf32> -> vector<8x8xf32>
    %21 = vector.shape_cast %20 : vector<8x8xf32> to vector<1x8x8xf32>
    %22 = arith.addf %17, %21 : vector<1x8x8xf32>
    %c48 = arith.constant 48 : index
    %c0_13 = arith.constant 0 : index
    %23 = vector.load %arg4[%c48, %c0_13] : memref<64x8xf32, #tpu.memory_space<vmem>>, vector<16x8xf32>
    %24 = vector.shape_cast %7 : vector<1x8x16xf32> to vector<8x16xf32>
    %cst_14 = arith.constant dense<0.000000e+00> : vector<8x8xf32>
    %25 = tpu.matmul %24, %23, %cst_14 {dimension_numbers = #tpu.dot_dimension_numbers<[1], [0], [0], [1], [0, 0, 1, 1], [], []>} : vector<8x16xf32>, vector<16x8xf32>, vector<8x8xf32> -> vector<8x8xf32>
    %26 = vector.shape_cast %25 : vector<8x8xf32> to vector<1x8x8xf32>
    %27 = arith.addf %22, %26 : vector<1x8x8xf32>
    %c0_15 = arith.constant 0 : index
    %c7 = arith.constant 7 : index
    %c0_16 = arith.constant 0 : index
    %c0_17 = arith.constant 0 : index
    %28 = vector.load %arg5[%c0_15, %c7, %c0_16, %c0_17] : memref<1x8x8x8xf32, #tpu.memory_space<vmem>>, vector<1x1x8x8xf32>
    %29 = vector.shape_cast %28 : vector<1x1x8x8xf32> to vector<1x8x8xf32>
    %30 = vector.shape_cast %27 : vector<1x8x8xf32> to vector<1x1x8x8xf32>
    tpu.vector_store %arg5[%c0_15, %c7, %c0_16, %c0_17], %30 {strides = array<i32>} : memref<1x8x8x8xf32, #tpu.memory_space<vmem>>, vector<1x1x8x8xf32>,
    %31 = vector.extract_strided_slice %16 {offsets = [0, 0, 0], sizes = [7, 8, 8], strides = [1, 1, 1]} : vector<8x8x8xf32> to vector<7x8x8xf32>
    %32 = vector.extract_strided_slice %4 {offsets = [1, 0, 0], sizes = [7, 8, 16], strides = [1, 1, 1]} : vector<8x8x16xf32> to vector<7x8x16xf32>
    %c32_18 = arith.constant 32 : index
    %c0_19 = arith.constant 0 : index
    %33 = vector.load %arg4[%c32_18, %c0_19] : memref<64x8xf32, #tpu.memory_space<vmem>>, vector<16x8xf32>
    %34 = vector.shape_cast %32 : vector<7x8x16xf32> to vector<56x16xf32>
    %cst_20 = arith.constant dense<0.000000e+00> : vector<56x8xf32>
    %35 = tpu.matmul %34, %33, %cst_20 {dimension_numbers = #tpu.dot_dimension_numbers<[1], [0], [0], [1], [0, 0, 1, 1], [], []>} : vector<56x16xf32>, vector<16x8xf32>, vector<56x8xf32> -> vector<56x8xf32>
    %36 = vector.shape_cast %35 : vector<56x8xf32> to vector<7x8x8xf32>
    %37 = arith.addf %31, %36 : vector<7x8x8xf32>
    %38 = vector.extract_strided_slice %5 {offsets = [1, 0, 0], sizes = [7, 8, 16], strides = [1, 1, 1]} : vector<8x8x16xf32> to vector<7x8x16xf32>
    %c48_21 = arith.constant 48 : index
    %c0_22 = arith.constant 0 : index
    %39 = vector.load %arg4[%c48_21, %c0_22] : memref<64x8xf32, #tpu.memory_space<vmem>>, vector<16x8xf32>
    %40 = vector.shape_cast %38 : vector<7x8x16xf32> to vector<56x16xf32>
    %cst_23 = arith.constant dense<0.000000e+00> : vector<56x8xf32>
    %41 = tpu.matmul %40, %39, %cst_23 {dimension_numbers = #tpu.dot_dimension_numbers<[1], [0], [0], [1], [0, 0, 1, 1], [], []>} : vector<56x16xf32>, vector<16x8xf32>, vector<56x8xf32> -> vector<56x8xf32>
    %42 = vector.shape_cast %41 : vector<56x8xf32> to vector<7x8x8xf32>
    %43 = arith.addf %37, %42 : vector<7x8x8xf32>
    %c0_24 = arith.constant 0 : index
    %c0_25 = arith.constant 0 : index
    %c0_26 = arith.constant 0 : index
    %c0_27 = arith.constant 0 : index
    %44 = vector.load %arg5[%c0_24, %c0_25, %c0_26, %c0_27] : memref<1x8x8x8xf32, #tpu.memory_space<vmem>>, vector<1x7x8x8xf32>
    %45 = vector.shape_cast %44 : vector<1x7x8x8xf32> to vector<7x8x8xf32>
    %46 = vector.shape_cast %43 : vector<7x8x8xf32> to vector<1x7x8x8xf32>
    tpu.vector_store %arg5[%c0_24, %c0_25, %c0_26, %c0_27], %46 {strides = array<i32>} : memref<1x8x8x8xf32, #tpu.memory_space<vmem>>, vector<1x7x8x8xf32>,
    return
  }
  func.func @transform_0(%arg0: i32, %arg1: i32) -> (i32, i32, i32, i32) {
    %c0_i32 = arith.constant 0 : i32
    %c0_i32_0 = arith.constant 0 : i32
    %c0_i32_1 = arith.constant 0 : i32
    return %arg0, %arg1, %c0_i32, %c0_i32_0 : i32, i32, i32, i32
  }
  func.func @transform_1(%arg0: i32, %arg1: i32) -> (i32, i32, i32, i32) {
    %c1_i32 = arith.constant 1 : i32
    %0 = arith.addi %arg1, %c1_i32 : i32
    %c8_i32 = arith.constant 8 : i32
    %1 = arith.muli %0, %c8_i32 : i32
    %c0_i32 = arith.constant 0 : i32
    %c0_i32_0 = arith.constant 0 : i32
    %c0_i32_1 = arith.constant 0 : i32
    return %arg0, %1, %c0_i32, %c0_i32_0 : i32, i32, i32, i32
  }
  func.func @transform_2(%arg0: i32, %arg1: i32) -> (i32, i32) {
    %c0_i32 = arith.constant 0 : i32
    %c0_i32_0 = arith.constant 0 : i32
    %c0_i32_1 = arith.constant 0 : i32
    return %c0_i32, %c0_i32_0 : i32, i32
  }
  func.func @transform_3(%arg0: i32, %arg1: i32) -> (i32, i32, i32, i32) {
    %c0_i32 = arith.constant 0 : i32
    %c0_i32_0 = arith.constant 0 : i32
    %c0_i32_1 = arith.constant 0 : i32
    return %arg0, %arg1, %c0_i32, %c0_i32_0 : i32, i32, i32, i32
  }
}

</mosaic_0001>

<bundles_post_ra>
// kernel: downsample_forward.1
= control target key start
LH: loop header
LB: loop body
LE: loop exit
PB: predicated region body
PF: predicated region fallthrough
CT: control target
= control target key end

     0   :  { %s1356_s12 = smov 0   ;;  %s1358_s13 = smov 0   ;;  %s1592_s0 = inlined_call_operand.vmem [shape: f32[2,9,9,16], index: 0, kind: input, shape index: {}, may-alias: {0,1}]   ;;  %s1593_s1 = inlined_call_operand.vmem [shape: f32[2,9,9,16], index: 1, kind: input, shape index: {}, may-alias: {0,1}]   ;;  %s1594_s2 = inlined_call_operand.vmem [shape: f32[64,8], index: 2, kind: input, shape index: {}]   ;;  %s1595_s3 = inlined_call_operand.vmem [shape: f32[2,8,8,8], index: 3, kind: output, shape index: {}]  }
   0x1   :  { %s1360_s14 = smov 0  }
   0x2 LB: > { %s25_s15 = sadd.s32 1, %s1328_s13  ;;  %p1098_p0 = scmp.ge.s32.totalorder %s1332_s14, 1  ;;  %s1332_s14 = sphi %s1360_s14, %s13_s14   ;;  %s1328_s13 = sphi %s1358_s13, %s1597_s13   ;;  %s1324_s12 = sphi %s1356_s12, %s1596_s12  }
   0x3   : > { %p27_p1 = scmp.ge.s32.totalorder %s25_s15, 2  ;;  %p193_p2 = scmp.lt.s32.totalorder %s1332_s14, 3 }
   0x5   : > { %s1599_s15 = smov (%p27_p1, %s25_s15), 0  ;;  %p194_p3 = pnand %p1098_p0, %p193_p2 }
   0x6   : > { %p248_p4 = scmp.lt.s32.totalorder (!%p194_p3), %s1324_s12, 1 }
   0x7   : > { %197 = sbr.rel (%p194_p3) target bundleno = 262 (0x106), region = 32 }
   0xc   : > { %v305_v0 = vld [vmem:[%s1594_s2 + $0x8] sm:$0xff]  ;;  %v304_v1 = vld [vmem:[%s1594_s2] sm:$0xff]  ;;  %v437_v2 = vld [vmem:[%s1594_s2 + $0x18] sm:$0xff]  ;;  %s1601_s12 = smov (!%p248_p4, %s1324_s12), 1  ;;  %vm306_vm0 = vcmask 130048   ;;  %v1334_v4 = vmov 0.0  }
   0xd   : > { %1185 = vmatprep.subr.mxu0 %v305_v0  ;;  %1201 = vmatprep.subr.mxu1 %v437_v2  ;;  %v436_v3 = vld [vmem:[%s1594_s2 + $0x10] sm:$0xff]  ;;  %s1281_s24 = smul.u32 144, %s1601_s12  ;;  %v1401_v5 = vld [vmem:[%s1594_s2 + $0x28] sm:$0xff]  ;;  %vm446_vm1 = vcmask 1046528   ;;  %v1411_v9 = vld [vmem:[%s1594_s2 + $0x20] sm:$0xff]  ;;  %vm1335_vm2 = vmmov 0  }
   0xe   : > { %1186 = vmatpush3.msra.mxu0 %v305_v0  ;;  %1202 = vmatpush3.msra.mxu1 %v437_v2  ;;  %v1422_v15 = vld [vmem:[%s1594_s2 + $0x38] sm:$0xff]  ;;  %v676_v43 = vld [vmem:[%s1594_s2 + $0x30] sm:$0xff]  ;;  %s1140_s17 = sshll.u32 %s1601_s12, 6  ;;  %vm756_vm3 = vcmask 64512  }
   0xf   : > { %1187 = vmatprep.subr.mxu0 %v304_v1  ;;  %1203 = vmatprep.subr.mxu1 %v436_v3  ;;  %s1396_s27 = scalar_lea.vmem %s1592_s0, %s1281_s24  ;;  %s1139_s7 = sadd.s32 128, %s1281_s24 }
  0x10   : > { %1188 = vmatpush3.msra.mxu0 %v304_v1  ;;  %1204 = vmatpush3.msra.mxu1 %v436_v3  ;;  %v286_v6 = vld [vmem:[%s1396_s27] sm:$0xff]  ;;  %v1405_v7 = vld [vmem:[%s1396_s27 + $0x10] sm:$0xff]  ;;  %v287_v8 = vld [vmem:[%s1396_s27 + $0x8] sm:$0x1]  ;;  %s273_s16 = scalar_lea.vmem %s1593_s1, %s1139_s7  ;;  %s1565_s20 = scalar_lea.vmem %s1595_s3, %s1140_s17 }
  0x11   : > { %1217 = vmatprep.subr.mxu0 %v1334_v4  ;;  %1224 = vmatprep.subr.mxu1 %v1334_v4  ;;  %v447_v10 = vrot.slane %v286_v6, 1  ;;  %v450_v11 = vrot.slane %v1405_v7, 1  ;;  %v448_v12 = vrot.slane %v287_v8, 1  ;;  %v1416_v13 = vld [vmem:[%s1396_s27 + $0x20] sm:$0xff]  ;;  %v289_v14 = vld [vmem:[%s1396_s27 + $0x18] sm:$0x1] }
  0x12   : > { %1189 = vmatprep.mubr.msk.f32.mxu0 %vm306_vm0, %v286_v6  ;;  %v453_v16 = vrot.slane %v1416_v13, 1  ;;  %v451_v17 = vrot.slane %v289_v14, 1  ;;  %v1428_v18 = vld [vmem:[%s1396_s27 + $0x30] sm:$0xff]  ;;  %v291_v19 = vld [vmem:[%s1396_s27 + $0x28] sm:$0x1]  ;;  %v1432_v20 = vld [vmem:[%s1396_s27 + $0x40] sm:$0xff] }
  0x13   : > { %1190 = vmatmul.mubr.msk.f32.vlgmr.msra.gmra.mxu0 %vm306_vm0, %v1405_v7  ;;  %v449_v21 = vsel %vm446_vm1, %v447_v10, %v448_v12  ;;  %v456_v22 = vrot.slane %v1428_v18, 1  ;;  %v454_v23 = vrot.slane %v291_v19, 1  ;;  %v459_v24 = vrot.slane %v1432_v20, 1  ;;  %v293_v25 = vld [vmem:[%s1396_s27 + $0x38] sm:$0x1]  ;;  %v1442_v26 = vld [vmem:[%s1396_s27 + $0x50] sm:$0xff] }
  0x14   : > { %1218 = vmatpush3.msra.mxu0 %v1401_v5  ;;  %1192 = vmatprep.mubr.msk.f32.mxu0 %vm306_vm0, %v1416_v13  ;;  %v1446_v27 = vsel %vm446_vm1, %v450_v11, %v451_v17  ;;  %v457_v28 = vrot.slane %v293_v25, 1  ;;  %v295_v29 = vld [vmem:[%s1396_s27 + $0x48] sm:$0x1]  ;;  %v1451_v30 = vld [vmem:[%s1396_s27 + $0x60] sm:$0xff]  ;;  %v297_v33 = vld [vmem:[%s1396_s27 + $0x58] sm:$0x1] }
  0x15   : > { %1205 = vmatprep.mubr.msk.f32.mxu1 %vm306_vm0, %v449_v21  ;;  %1219 = vmatprep.subr.mxu0 %v1334_v4  ;;  %v455_v31 = vsel %vm446_vm1, %v453_v16, %v454_v23  ;;  %v460_v32 = vrot.slane %v295_v29, 1  ;;  %v462_v35 = vrot.slane %v1442_v26, 1  ;;  %v463_v36 = vrot.slane %v297_v33, 1  ;;  %v299_v37 = vld [vmem:[%s1396_s27 + $0x68] sm:$0x1]  ;;  %v1472_v40 = vld [vmem:[%s1396_s27 + $0x70] sm:$0xff] }
  0x16   : > { %1206 = vmatmul.mubr.msk.f32.vlgmr.msra.gmra.mxu1 %vm306_vm0, %v1446_v27  ;;  %1220 = vmatpush3.msra.mxu0 %v1411_v9  ;;  %v458_v34 = vsel %vm446_vm1, %v456_v22, %v457_v28  ;;  %v465_v39 = vrot.slane %v1451_v30, 1  ;;  %v466_v41 = vrot.slane %v299_v37, 1  ;;  %v301_v42 = vld [vmem:[%s1396_s27 + $0x78] sm:$0x1]  ;;  %v468_v45 = vrot.slane %v1472_v40, 1  ;;  %v302_v48 = vld [vmem:[%s273_s16] sm:$0xff] }
  0x17   : > { %1225 = vmatpush3.msra.mxu1 %v1422_v15  ;;  %1193 = vmatmul.mubr.msk.f32.gmra.mxu0 %vm306_vm0, %v1428_v18  ;;  %v461_v38 = vsel %vm446_vm1, %v459_v24, %v460_v32  ;;  %v464_v44 = vsel %vm446_vm1, %v462_v35, %v463_v36  ;;  %v469_v46 = vrot.slane %v301_v42, 1  ;;  %v303_v49 = vld [vmem:[%s273_s16 + $0x8] sm:$0x1]  ;;  %v679_v51 = vrot.slane %v302_v48, 1 }
  0x18   : > { %1208 = vmatprep.mubr.msk.f32.mxu1 %vm306_vm0, %v455_v31  ;;  %1195 = vmatprep.mubr.msk.f32.mxu0 %vm306_vm0, %v1432_v20  ;;  %v467_v47 = vsel %vm446_vm1, %v465_v39, %v466_v41  ;;  %v680_v52 = vrot.slane %v303_v49, 1 }
  0x19   : > { %1226 = vmatprep.subr.mxu1 %v1334_v4  ;;  %1231 = vmatprep.subr.mxu0 %v1334_v4  ;;  %v470_v50 = vsel %vm446_vm1, %v468_v45, %v469_v46 }
  0x1a   : > { %1209 = vmatmul.mubr.msk.f32.gmra.mxu1 %vm306_vm0, %v458_v34  ;;  %v681_v53 = vsel %vm446_vm1, %v679_v51, %v680_v52 }
  0x1b   : > { %1196 = vmatmul.mubr.msk.f32.gmra.mxu0 %vm306_vm0, %v1442_v26  ;;  %1211 = vmatprep.mubr.msk.f32.mxu1 %vm306_vm0, %v461_v38 }
  0x1c   : > { %1198 = vmatprep.mubr.msk.f32.mxu0 %vm306_vm0, %v1451_v30  ;;  %1227 = vmatpush3.msra.mxu1 %v676_v43 }
  0x1d   : > { %1256 = vmatprep.subr.mxu1 %v1334_v4 }
  0x1e   : > { %1212 = vmatmul.mubr.msk.f32.gmra.mxu1 %vm306_vm0, %v464_v44 }
  0x1f   : > { %1199 = vmatmul.mubr.msk.f32.gmra.mxu0 %vm306_vm0, %v1472_v40  ;;  %1214 = vmatprep.mubr.msk.f32.mxu1 %vm306_vm0, %v467_v47 }
  0x20   : > { %1221 = vmatprep.mubr.msk.f32.mxu0 %vm1335_vm2, %v1334_v4 }
  0x22   : > { %1215 = vmatmul.mubr.msk.f32.gmra.mxu1 %vm306_vm0, %v470_v50 }
  0x23   : > { %1222 = vmatmul.mubr.msk.f32.vlgmr.msra.gmra.mxu0 %vm306_vm0, %v302_v48  ;;  %1228 = vmatprep.mubr.msk.f32.mxu1 %vm1335_vm2, %v1334_v4 }
  0x24   : > { %1232 = vmatpush3.msra.mxu0 %v1401_v5  ;;  %1235 = vmatprep.mubr.msk.f32.mxu0 %vm1335_vm2, %v1334_v4 }
  0x25   : > { %1233 = vmatprep.subr.mxu0 %v1334_v4 }
  0x26   : > { %1229 = vmatmul.mubr.msk.f32.vlgmr.msra.gmra.mxu1 %vm306_vm0, %v681_v53  ;;  %1234 = vmatpush3.msra.mxu0 %v1411_v9 }
  0x27   : > { %1257 = vmatpush3.msra.mxu1 %v1422_v15  ;;  %1236 = vmatmul.mubr.msk.f32.vlgmr.msra.gmra.mxu0 %vm306_vm0, %v1405_v7 }
  0x28   : > { %1258 = vmatprep.subr.mxu1 %v1334_v4  ;;  %1260 = vmatprep.mubr.msk.f32.mxu1 %vm1335_vm2, %v1334_v4 }
  0x29   : > { %1259 = vmatpush3.msra.mxu1 %v676_v43  ;;  %1238 = vmatprep.mubr.msk.f32.mxu0 %vm1335_vm2, %v1334_v4 }
  0x2a   : > { %1261 = vmatmul.mubr.msk.f32.vlgmr.msra.gmra.mxu1 %vm306_vm0, %v1446_v27 }
  0x2b   : > { %1239 = vmatmul.mubr.msk.f32.gmra.mxu0 %vm306_vm0, %v1416_v13  ;;  %1263 = vmatprep.mubr.msk.f32.mxu1 %vm1335_vm2, %v1334_v4 }
  0x2c   : > { %1241 = vmatprep.mubr.msk.f32.mxu0 %vm1335_vm2, %v1334_v4 }
  0x2e   : > { %1264 = vmatmul.mubr.msk.f32.gmra.mxu1 %vm306_vm0, %v455_v31 }
  0x2f   : > { %1242 = vmatmul.mubr.msk.f32.gmra.mxu0 %vm306_vm0, %v1428_v18  ;;  %1266 = vmatprep.mubr.msk.f32.mxu1 %vm1335_vm2, %v1334_v4 }
  0x30   : > { %1244 = vmatprep.mubr.msk.f32.mxu0 %vm1335_vm2, %v1334_v4 }
  0x32   : > { %1267 = vmatmul.mubr.msk.f32.gmra.mxu1 %vm306_vm0, %v458_v34 }
  0x33   : > { %1245 = vmatmul.mubr.msk.f32.gmra.mxu0 %vm306_vm0, %v1432_v20  ;;  %1269 = vmatprep.mubr.msk.f32.mxu1 %vm1335_vm2, %v1334_v4 }
  0x34   : > { %1247 = vmatprep.mubr.msk.f32.mxu0 %vm1335_vm2, %v1334_v4 }
  0x36   : > { %1270 = vmatmul.mubr.msk.f32.gmra.mxu1 %vm306_vm0, %v461_v38 }
  0x37   : > { %1248 = vmatmul.mubr.msk.f32.gmra.mxu0 %vm306_vm0, %v1442_v26  ;;  %1272 = vmatprep.mubr.msk.f32.mxu1 %vm1335_vm2, %v1334_v4 }
  0x38   : > { %1250 = vmatprep.mubr.msk.f32.mxu0 %vm1335_vm2, %v1334_v4 }
  0x3a   : > { %1273 = vmatmul.mubr.msk.f32.gmra.mxu1 %vm306_vm0, %v464_v44 }
  0x3b   : > { %1251 = vmatmul.mubr.msk.f32.gmra.mxu0 %vm306_vm0, %v1451_v30  ;;  %1275 = vmatprep.mubr.msk.f32.mxu1 %vm1335_vm2, %v1334_v4 }
  0x3c   : > { %1253 = vmatprep.mubr.msk.f32.mxu0 %vm1335_vm2, %v1334_v4 }
  0x3e   : > { %1276 = vmatmul.mubr.msk.f32.gmra.mxu1 %vm306_vm0, %v467_v47 }
  0x3f   : > { %1254 = vmatmul.mubr.msk.f32.gmra.mxu0 %vm306_vm0, %v1472_v40  ;;  %1278 = vmatprep.mubr.msk.f32.mxu1 %vm1335_vm2, %v1334_v4 }
  0x42   : > { %1279 = vmatmul.mubr.msk.f32.gmra.mxu1 %vm306_vm0, %v470_v50 }
  0xd3   : > { %v1191_v54 = vpop.f32.mrf.mxu0 }
  0xd5   : > { %v397_v55 = vpop.f32.mrf.mxu0 }
  0xd6   : > { %v1207_v56 = vpop.f32.mrf.mxu1 }
  0xd7   : > { %v1194_v57 = vpop.f32.mrf.mxu0  ;;  %v593_v17 = vadd.f32 %v1207_v56, %v1191_v54 }
  0xd8   : > { %v553_v58 = vpop.f32.mrf.mxu1 }
  0xd9   : > { %v407_v59 = vpop.f32.mrf.mxu0  ;;  %v592_v10 = vadd.f32 %v553_v58, %v397_v55 }
  0xda   : > { %v1210_v60 = vpop.f32.mrf.mxu1 }
  0xdb   : > { %v1197_v61 = vpop.f32.mrf.mxu0  ;;  %v595_v31 = vadd.f32 %v1210_v60, %v1194_v57 }
  0xdc   : > { %v563_v62 = vpop.f32.mrf.mxu1 }
  0xdd   : > { %v417_v63 = vpop.f32.mrf.mxu0  ;;  %v594_v24 = vadd.f32 %v563_v62, %v407_v59 }
  0xde   : > { %v1213_v0 = vpop.f32.mrf.mxu1 }
  0xdf   : > { %v1200_v1 = vpop.f32.mrf.mxu0  ;;  %v597_v45 = vadd.f32 %v1213_v0, %v1197_v61 }
  0xe0   : > { %v573_v2 = vpop.f32.mrf.mxu1 }
  0xe1   : > { %v427_v3 = vpop.f32.mrf.mxu0  ;;  %v596_v38 = vadd.f32 %v573_v2, %v417_v63 }
  0xe2   : > { %v1216_v5 = vpop.f32.mrf.mxu1 }
  0xe3   : > { %v599_v6 = vadd.f32 %v1216_v5, %v1200_v1  ;;  %v671_v4 = vpop.f32.mrf.mxu0 }
  0xe4   : > { %v583_v7 = vpop.f32.mrf.mxu1 }
  0xe5   : > { %v675_v8 = vadd.f32 %v671_v4, %v599_v6  ;;  %v1223_v9 = vpop.f32.mrf.mxu0  ;;  %v598_v52 = vadd.f32 %v583_v7, %v427_v3 }
  0xe6   : > { %v750_v11 = vpop.f32.mrf.mxu1 }
  0xe7   : > { %v754_v12 = vadd.f32 %v750_v11, %v675_v8  ;;  %v826_v13 = vpop.f32.mrf.mxu0 }
  0xe8   : > { %v860_v14 = vadd.f32 %v826_v13, %v592_v10  ;;  %v1230_v15 = vpop.f32.mrf.mxu1 }
  0xe9   : > { %1121 = vst.msk [vmem:[%s1565_s20 + $0x38] sm:$0xff] %vm756_vm3, %v754_v12  ;;  %v1237_v16 = vpop.f32.mrf.mxu0 }
  0xea   : > { %v935_v18 = vpop.f32.mrf.mxu1 }
  0xeb   : > { %v969_v19 = vadd.f32 %v935_v18, %v860_v14  ;;  %v831_v20 = vpop.f32.mrf.mxu0 }
  0xec   : > { %v861_v21 = vadd.f32 %v831_v20, %v593_v17  ;;  %v1262_v22 = vpop.f32.mrf.mxu1 }
  0xed   : > { %976 = vst.msk [vmem:[%s1565_s20] sm:$0xff] %vm756_vm3, %v969_v19  ;;  %v1240_v23 = vpop.f32.mrf.mxu0 }
  0xee   : > { %v940_v25 = vpop.f32.mrf.mxu1 }
  0xef   : > { %v970_v26 = vadd.f32 %v940_v25, %v861_v21  ;;  %v836_v27 = vpop.f32.mrf.mxu0 }
  0xf0   : > { %v862_v28 = vadd.f32 %v836_v27, %v594_v24  ;;  %v1265_v29 = vpop.f32.mrf.mxu1 }
  0xf1   : > { %977 = vst.msk [vmem:[%s1565_s20 + $0x8] sm:$0xff] %vm756_vm3, %v970_v26  ;;  %v1243_v30 = vpop.f32.mrf.mxu0 }
  0xf2   : > { %v945_v32 = vpop.f32.mrf.mxu1 }
  0xf3   : > { %v971_v33 = vadd.f32 %v945_v32, %v862_v28  ;;  %v841_v34 = vpop.f32.mrf.mxu0 }
  0xf4   : > { %v863_v35 = vadd.f32 %v841_v34, %v595_v31  ;;  %v1268_v36 = vpop.f32.mrf.mxu1 }
  0xf5   : > { %978 = vst.msk [vmem:[%s1565_s20 + $0x10] sm:$0xff] %vm756_vm3, %v971_v33  ;;  %v1246_v37 = vpop.f32.mrf.mxu0 }
  0xf6   : > { %v950_v39 = vpop.f32.mrf.mxu1 }
  0xf7   : > { %v972_v40 = vadd.f32 %v950_v39, %v863_v35  ;;  %v846_v41 = vpop.f32.mrf.mxu0 }
  0xf8   : > { %v864_v42 = vadd.f32 %v846_v41, %v596_v38  ;;  %v1271_v43 = vpop.f32.mrf.mxu1 }
  0xf9   : > { %979 = vst.msk [vmem:[%s1565_s20 + $0x18] sm:$0xff] %vm756_vm3, %v972_v40  ;;  %v1249_v44 = vpop.f32.mrf.mxu0 }
  0xfa   : > { %v955_v46 = vpop.f32.mrf.mxu1 }
  0xfb   : > { %v973_v47 = vadd.f32 %v955_v46, %v864_v42  ;;  %v851_v48 = vpop.f32.mrf.mxu0 }
  0xfc   : > { %v865_v49 = vadd.f32 %v851_v48, %v597_v45  ;;  %v1274_v50 = vpop.f32.mrf.mxu1 }
  0xfd   : > { %980 = vst.msk [vmem:[%s1565_s20 + $0x20] sm:$0xff] %vm756_vm3, %v973_v47  ;;  %v1252_v51 = vpop.f32.mrf.mxu0 }
  0xfe   : > { %v960_v53 = vpop.f32.mrf.mxu1 }
  0xff   : > { %v974_v54 = vadd.f32 %v960_v53, %v865_v49  ;;  %v856_v55 = vpop.f32.mrf.mxu0 }
 0x100   : > { %v866_v56 = vadd.f32 %v856_v55, %v598_v52  ;;  %v1277_v57 = vpop.f32.mrf.mxu1 }
 0x101   : > { %981 = vst.msk [vmem:[%s1565_s20 + $0x28] sm:$0xff] %vm756_vm3, %v974_v54  ;;  %v1255_v58 = vpop.f32.mrf.mxu0 }
 0x102   : > { %v965_v59 = vpop.f32.mrf.mxu1 }
 0x103   : > { %v975_v60 = vadd.f32 %v965_v59, %v866_v56 }
 0x104   : > { %v1280_v61 = vpop.f32.mrf.mxu1 }
 0x105   : > { %982 = vst.msk [vmem:[%s1565_s20 + $0x30] sm:$0xff] %vm756_vm3, %v975_v60 }
 0x106 PF: > { %s13_s14 = sadd.s32 1, %s1332_s14   ;;  %s1596_s12 = smov %s1328_s13 }
 0x107   : > { %p10_p5 = scmp.ge.s32.totalorder %s13_s14, 4   ;;  %s1597_s13 = smov %s1599_s15 }
 0x109   :  { %12 = sbr.rel (!%p10_p5) target bundleno = 2 (0x2), region = 66 }

</bundles_post_ra>
